<compile_context>
chip_gen: v7x
topology: tpu7x:2x2x1
jax: 0.10.0
libtpu: 0.0.40
codegen_flags: <defaults>
</compile_context>

<pallas_src>
import functools

import jax
import jax.numpy as jnp
from jax.experimental import pallas as pl
from jax.experimental.pallas import tpu as pltpu


def _round_up(x, m):
    return (x + m - 1) // m * m


def _conv3x3_kernel(x_ref, w_ref, b_ref, o_ref, xpad_ref, xcol_ref, *,
                    C, H, W, Wp, L_out):
    # x_ref:    (1, C, H*W)       f32   unpadded image, spatial dims flattened
    # w_ref:    (o_blk, 9*Cp)     bf16  weight taps, tap-major / channel-minor
    # b_ref:    (o_blk, 1)        f32   bias
    # o_ref:    (1, o_blk, L_out)       flat H x Wp rows (+ lane pad); caller trims
    # xpad_ref: (Cp, Lp_in)       bf16  zero-padded flat image scratch
    # xcol_ref: (9*Cp, L_out)     bf16  im2col scratch
    Cp = xpad_ref.shape[0]

    # Build padded image + im2col scratch ONCE per image.  Scratch persists
    # across the ob axis; ob is "arbitrary" so every core runs ob == 0 first.
    @pl.when(pl.program_id(1) == 0)
    def _build():
        # Zero halo rows/cols, padded channels and lane padding (keeps the
        # matmul K rows for padded channels exactly zero).
        xpad_ref[...] = jnp.zeros_like(xpad_ref)
        # In-kernel ZeroPad2d(1): copy each row into the interior of the padded
        # flat image (row stride Wp), casting f32 -> bf16 on the fly.
        for r in range(H):
            dst = (r + 1) * Wp + 1
            xpad_ref[0:C, dst:dst + W] = (
                x_ref[0, :, r * W:(r + 1) * W].astype(xpad_ref.dtype))
        # Flat-shift im2col: tap (dy, dx)'s slab is one contiguous static lane
        # slice of the flat padded image at offset dy*Wp + dx.
        for dy in range(3):
            for dx in range(3):
                t = dy * 3 + dx
                off = dy * Wp + dx
                xcol_ref[t * Cp:(t + 1) * Cp, :] = xpad_ref[:, off:off + L_out]

    # One deep MXU contraction: (o_blk, 9*Cp) @ (9*Cp, L_out), bf16 in, f32 acc.
    acc = jnp.dot(w_ref[...], xcol_ref[...], preferred_element_type=jnp.float32)
    acc = acc + b_ref[...]                    # (o_blk, 1) broadcasts over lanes
    o_ref[0] = acc.astype(o_ref.dtype)


@jax.jit
def conv3x3_pallas(x, weight, bias):
    """ZeroPad2d(1) + Conv2d(C->O, kernel 3).  x: (N,C,H,W) -> (N,O,H,W)."""
    # TODO(synk): ReflectionPad2d (use_refl=True) variant not implemented; this
    # is the module's default ZeroPad2d path.
    N, C, H, W = x.shape
    O = weight.shape[0]
    Wp = W + 2

    # Lane-/sublane-aligned sizes.
    Cp = _round_up(C, 16)                        # bf16 sublane packing
    L_out = _round_up(H * Wp, 128)               # flat output cols (lane dense)
    Lp_in = _round_up(2 * Wp + 2 + L_out, 128)   # covers the dy=2, dx=2 tap

    # --- wrapper glue: layout plumbing only (no pad / cast HBM pass) ---------
    x_flat = x.reshape(N, C, H * W)
    # (O, C, 3, 3) -> (O, 3, 3, Cp) -> (O, 9*Cp): tap-major / channel-minor.
    w_t = jnp.transpose(weight, (0, 2, 3, 1))
    w_t = jnp.pad(w_t, ((0, 0), (0, 0), (0, 0), (0, Cp - C)))
    w_mat = w_t.reshape(O, 9 * Cp).astype(jnp.bfloat16)
    b_col = bias.reshape(O, 1).astype(jnp.float32)

    # Output-channel tiling: 256 matches the 2x256^2 MXU of v6e/v7x, 128 is the
    # native v5e tile.
    if O % 256 == 0:
        o_blk = 256
    elif O % 128 == 0:
        o_blk = 128
    else:
        o_blk = O
    grid = (N, O // o_blk)
    # TODO(synk): for production H/W (>=128) add a "parallel" grid axis over
    # output-row blocks (2-row halo via manual make_async_copy) so the working
    # set fits v7x's 64 MiB VMEM and the accumulator shrinks.

    kernel = functools.partial(_conv3x3_kernel, C=C, H=H, W=W, Wp=Wp,
                               L_out=L_out)

    # VMEM budget: double-buffered blocks + persistent scratch, with headroom.
    vmem_bytes = int(1.5 * (
        2 * C * H * W * x.dtype.itemsize             # x block (double-buffered)
        + 2 * o_blk * 9 * Cp * 2 + 2 * o_blk * 4     # weight + bias blocks
        + 2 * o_blk * L_out * x.dtype.itemsize       # output block
        + Cp * Lp_in * 2 + 9 * Cp * L_out * 2))      # xpad + xcol scratch
    vmem_limit = min(max(vmem_bytes, 32 * 1024 * 1024), 100 * 1024 * 1024)

    out_flat = pl.pallas_call(
        kernel,
        out_shape=jax.ShapeDtypeStruct((N, O, L_out), x.dtype),
        grid_spec=pltpu.PrefetchScalarGridSpec(
            num_scalar_prefetch=0,
            grid=grid,
            in_specs=[
                pl.BlockSpec((1, C, H * W), lambda n, ob: (n, 0, 0)),
                pl.BlockSpec((o_blk, 9 * Cp), lambda n, ob: (ob, 0)),
                pl.BlockSpec((o_blk, 1), lambda n, ob: (ob, 0)),
            ],
            out_specs=pl.BlockSpec((1, o_blk, L_out), lambda n, ob: (n, ob, 0)),
            scratch_shapes=[
                pltpu.VMEM((Cp, Lp_in), jnp.bfloat16),
                pltpu.VMEM((9 * Cp, L_out), jnp.bfloat16),
            ],
        ),
        compiler_params=pltpu.CompilerParams(
            # ob MUST be "arbitrary": the scratch built at ob == 0 is reused by
            # every later ob step, so megacore may not shard that axis.
            dimension_semantics=("parallel", "arbitrary"),
            vmem_limit_bytes=vmem_limit,
        ),
    )(x_flat, w_mat, b_col)

    # Drop lane padding + the 2 wrap-around columns per row from the flat-shift
    # trick.  TODO(synk): emit bf16 / fuse the trim into the consumer when the
    # conv is HBM-bound.
    return out_flat[:, :, :H * Wp].reshape(N, O, H, Wp)[:, :, :, :W]


if __name__ == "__main__":
    key = jax.random.PRNGKey(0)
    kx, kw, kb = jax.random.split(key, 3)

    N, C_in, C_out, H, W = 2, 4, 8, 16, 16

    x = jax.random.normal(kx, (N, C_in, H, W), dtype=jnp.float32)
    # Deterministic synthetic params (Conv2d(in_channels, out_channels, 3)):
    weight = jax.random.normal(kw, (C_out, C_in, 3, 3), dtype=jnp.float32) * 0.1
    bias = jax.random.normal(kb, (C_out,), dtype=jnp.float32) * 0.1

    y = jax.block_until_ready(conv3x3_pallas(x, weight, bias))

    # Reference: same semantics as ZeroPad2d(1) + Conv2d(.,.,3) in PyTorch.
    y_ref = jax.lax.conv_general_dilated(
        x, weight, window_strides=(1, 1), padding=((1, 1), (1, 1)),
        dimension_numbers=("NCHW", "OIHW", "NCHW"),
    ) + bias.reshape(1, C_out, 1, 1)

    assert y.shape == (N, C_out, H, W)
    # MXU inputs are bf16 (f32 accumulate), so compare at bf16-level tolerance.
    assert jnp.allclose(y, y_ref, atol=3e-2, rtol=3e-2), float(
        jnp.max(jnp.abs(y - y_ref)))

    print("KERNEL_OK")
</pallas_src>

<mosaic_0001>
module attributes {stable_mosaic.version = 11 : i64} {
  func.func @_conv3x3_kernel(%arg0: i32, %arg1: i32, %arg2: memref<1x4x256xf32, #tpu.memory_space<vmem>>, %arg3: memref<8x144xbf16, #tpu.memory_space<vmem>>, %arg4: memref<8x1xf32, #tpu.memory_space<vmem>>, %arg5: memref<1x8x384xf32, #tpu.memory_space<vmem>>, %arg6: memref<16x512xbf16, #tpu.memory_space<vmem>>, %arg7: memref<144x384xbf16, #tpu.memory_space<vmem>>) attributes {dimension_semantics = [#tpu.dimension_semantics<parallel>, #tpu.dimension_semantics<arbitrary>], iteration_bounds = array<i64: 2, 1>, scalar_prefetch = 0 : i64, scratch_operands = 2 : i64, tpu.core_type = #tpu.core_type<tc>, window_params = [{transform_indices = @transform_0, window_bounds = array<i64: 1, 4, 256>}, {transform_indices = @transform_1, window_bounds = array<i64: 8, 144>}, {transform_indices = @transform_2, window_bounds = array<i64: 8, 1>}, {transform_indices = @transform_3, window_bounds = array<i64: 1, 8, 384>}]} {
    %c0_i32 = arith.constant 0 : i32
    %0 = arith.cmpi eq, %arg1, %c0_i32 : i32
    %1 = arith.extui %0 : i1 to i32
    %c0_i32_0 = arith.constant 0 : i32
    %2 = arith.cmpi ne, %1, %c0_i32_0 : i32
    scf.if %2 {
      %cst_9 = arith.constant 0.000000e+00 : bf16
      %12 = vector.broadcast %cst_9 : bf16 to vector<16x512xbf16>
      %c0_10 = arith.constant 0 : index
      %c0_11 = arith.constant 0 : index
      %13 = vector.load %arg6[%c0_10, %c0_11] : memref<16x512xbf16, #tpu.memory_space<vmem>>, vector<16x512xbf16>
      tpu.vector_store %arg6[%c0_10, %c0_11], %12 {strides = array<i32>} : memref<16x512xbf16, #tpu.memory_space<vmem>>, vector<16x512xbf16>,
      %c0_12 = arith.constant 0 : index
      %c0_13 = arith.constant 0 : index
      %c0_14 = arith.constant 0 : index
      %14 = vector.load %arg2[%c0_12, %c0_13, %c0_14] : memref<1x4x256xf32, #tpu.memory_space<vmem>>, vector<1x4x16xf32>
      %15 = vector.shape_cast %14 : vector<1x4x16xf32> to vector<4x16xf32>
      %16 = arith.truncf %15 : vector<4x16xf32> to vector<4x16xbf16>
      %c0_15 = arith.constant 0 : index
      %c19 = arith.constant 19 : index
      %17 = vector.load %arg6[%c0_15, %c19] : memref<16x512xbf16, #tpu.memory_space<vmem>>, vector<4x16xbf16>
      tpu.vector_store %arg6[%c0_15, %c19], %16 {strides = array<i32>} : memref<16x512xbf16, #tpu.memory_space<vmem>>, vector<4x16xbf16>,
      %c0_16 = arith.constant 0 : index
      %c0_17 = arith.constant 0 : index
      %c16 = arith.constant 16 : index
      %18 = vector.load %arg2[%c0_16, %c0_17, %c16] : memref<1x4x256xf32, #tpu.memory_space<vmem>>, vector<1x4x16xf32>
      %19 = vector.shape_cast %18 : vector<1x4x16xf32> to vector<4x16xf32>
      %20 = arith.truncf %19 : vector<4x16xf32> to vector<4x16xbf16>
      %c0_18 = arith.constant 0 : index
      %c37 = arith.constant 37 : index
      %21 = vector.load %arg6[%c0_18, %c37] : memref<16x512xbf16, #tpu.memory_space<vmem>>, vector<4x16xbf16>
      tpu.vector_store %arg6[%c0_18, %c37], %20 {strides = array<i32>} : memref<16x512xbf16, #tpu.memory_space<vmem>>, vector<4x16xbf16>,
      %c0_19 = arith.constant 0 : index
      %c0_20 = arith.constant 0 : index
      %c32 = arith.constant 32 : index
      %22 = vector.load %arg2[%c0_19, %c0_20, %c32] : memref<1x4x256xf32, #tpu.memory_space<vmem>>, vector<1x4x16xf32>
      %23 = vector.shape_cast %22 : vector<1x4x16xf32> to vector<4x16xf32>
      %24 = arith.truncf %23 : vector<4x16xf32> to vector<4x16xbf16>
      %c0_21 = arith.constant 0 : index
      %c55 = arith.constant 55 : index
      %25 = vector.load %arg6[%c0_21, %c55] : memref<16x512xbf16, #tpu.memory_space<vmem>>, vector<4x16xbf16>
      tpu.vector_store %arg6[%c0_21, %c55], %24 {strides = array<i32>} : memref<16x512xbf16, #tpu.memory_space<vmem>>, vector<4x16xbf16>,
      %c0_22 = arith.constant 0 : index
      %c0_23 = arith.constant 0 : index
      %c48 = arith.constant 48 : index
      %26 = vector.load %arg2[%c0_22, %c0_23, %c48] : memref<1x4x256xf32, #tpu.memory_space<vmem>>, vector<1x4x16xf32>
      %27 = vector.shape_cast %26 : vector<1x4x16xf32> to vector<4x16xf32>
      %28 = arith.truncf %27 : vector<4x16xf32> to vector<4x16xbf16>
      %c0_24 = arith.constant 0 : index
      %c73 = arith.constant 73 : index
      %29 = vector.load %arg6[%c0_24, %c73] : memref<16x512xbf16, #tpu.memory_space<vmem>>, vector<4x16xbf16>
      tpu.vector_store %arg6[%c0_24, %c73], %28 {strides = array<i32>} : memref<16x512xbf16, #tpu.memory_space<vmem>>, vector<4x16xbf16>,
      %c0_25 = arith.constant 0 : index
      %c0_26 = arith.constant 0 : index
      %c64 = arith.constant 64 : index
      %30 = vector.load %arg2[%c0_25, %c0_26, %c64] : memref<1x4x256xf32, #tpu.memory_space<vmem>>, vector<1x4x16xf32>
      %31 = vector.shape_cast %30 : vector<1x4x16xf32> to vector<4x16xf32>
      %32 = arith.truncf %31 : vector<4x16xf32> to vector<4x16xbf16>
      %c0_27 = arith.constant 0 : index
      %c91 = arith.constant 91 : index
      %33 = vector.load %arg6[%c0_27, %c91] : memref<16x512xbf16, #tpu.memory_space<vmem>>, vector<4x16xbf16>
      tpu.vector_store %arg6[%c0_27, %c91], %32 {strides = array<i32>} : memref<16x512xbf16, #tpu.memory_space<vmem>>, vector<4x16xbf16>,
      %c0_28 = arith.constant 0 : index
      %c0_29 = arith.constant 0 : index
      %c80 = arith.constant 80 : index
      %34 = vector.load %arg2[%c0_28, %c0_29, %c80] : memref<1x4x256xf32, #tpu.memory_space<vmem>>, vector<1x4x16xf32>
      %35 = vector.shape_cast %34 : vector<1x4x16xf32> to vector<4x16xf32>
      %36 = arith.truncf %35 : vector<4x16xf32> to vector<4x16xbf16>
      %c0_30 = arith.constant 0 : index
      %c109 = arith.constant 109 : index
      %37 = vector.load %arg6[%c0_30, %c109] : memref<16x512xbf16, #tpu.memory_space<vmem>>, vector<4x16xbf16>
      tpu.vector_store %arg6[%c0_30, %c109], %36 {strides = array<i32>} : memref<16x512xbf16, #tpu.memory_space<vmem>>, vector<4x16xbf16>,
      %c0_31 = arith.constant 0 : index
      %c0_32 = arith.constant 0 : index
      %c96 = arith.constant 96 : index
      %38 = vector.load %arg2[%c0_31, %c0_32, %c96] : memref<1x4x256xf32, #tpu.memory_space<vmem>>, vector<1x4x16xf32>
      %39 = vector.shape_cast %38 : vector<1x4x16xf32> to vector<4x16xf32>
      %40 = arith.truncf %39 : vector<4x16xf32> to vector<4x16xbf16>
      %c0_33 = arith.constant 0 : index
      %c127 = arith.constant 127 : index
      %41 = vector.load %arg6[%c0_33, %c127] : memref<16x512xbf16, #tpu.memory_space<vmem>>, vector<4x16xbf16>
      tpu.vector_store %arg6[%c0_33, %c127], %40 {strides = array<i32>} : memref<16x512xbf16, #tpu.memory_space<vmem>>, vector<4x16xbf16>,
      %c0_34 = arith.constant 0 : index
      %c0_35 = arith.constant 0 : index
      %c112 = arith.constant 112 : index
      %42 = vector.load %arg2[%c0_34, %c0_35, %c112] : memref<1x4x256xf32, #tpu.memory_space<vmem>>, vector<1x4x16xf32>
      %43 = vector.shape_cast %42 : vector<1x4x16xf32> to vector<4x16xf32>
      %44 = arith.truncf %43 : vector<4x16xf32> to vector<4x16xbf16>
      %c0_36 = arith.constant 0 : index
      %c145 = arith.constant 145 : index
      %45 = vector.load %arg6[%c0_36, %c145] : memref<16x512xbf16, #tpu.memory_space<vmem>>, vector<4x16xbf16>
      tpu.vector_store %arg6[%c0_36, %c145], %44 {strides = array<i32>} : memref<16x512xbf16, #tpu.memory_space<vmem>>, vector<4x16xbf16>,
      %c0_37 = arith.constant 0 : index
      %c0_38 = arith.constant 0 : index
      %c128 = arith.constant 128 : index
      %46 = vector.load %arg2[%c0_37, %c0_38, %c128] : memref<1x4x256xf32, #tpu.memory_space<vmem>>, vector<1x4x16xf32>
      %47 = vector.shape_cast %46 : vector<1x4x16xf32> to vector<4x16xf32>
      %48 = arith.truncf %47 : vector<4x16xf32> to vector<4x16xbf16>
      %c0_39 = arith.constant 0 : index
      %c163 = arith.constant 163 : index
      %49 = vector.load %arg6[%c0_39, %c163] : memref<16x512xbf16, #tpu.memory_space<vmem>>, vector<4x16xbf16>
      tpu.vector_store %arg6[%c0_39, %c163], %48 {strides = array<i32>} : memref<16x512xbf16, #tpu.memory_space<vmem>>, vector<4x16xbf16>,
      %c0_40 = arith.constant 0 : index
      %c0_41 = arith.constant 0 : index
      %c144 = arith.constant 144 : index
      %50 = vector.load %arg2[%c0_40, %c0_41, %c144] : memref<1x4x256xf32, #tpu.memory_space<vmem>>, vector<1x4x16xf32>
      %51 = vector.shape_cast %50 : vector<1x4x16xf32> to vector<4x16xf32>
      %52 = arith.truncf %51 : vector<4x16xf32> to vector<4x16xbf16>
      %c0_42 = arith.constant 0 : index
      %c181 = arith.constant 181 : index
      %53 = vector.load %arg6[%c0_42, %c181] : memref<16x512xbf16, #tpu.memory_space<vmem>>, vector<4x16xbf16>
      tpu.vector_store %arg6[%c0_42, %c181], %52 {strides = array<i32>} : memref<16x512xbf16, #tpu.memory_space<vmem>>, vector<4x16xbf16>,
      %c0_43 = arith.constant 0 : index
      %c0_44 = arith.constant 0 : index
      %c160 = arith.constant 160 : index
      %54 = vector.load %arg2[%c0_43, %c0_44, %c160] : memref<1x4x256xf32, #tpu.memory_space<vmem>>, vector<1x4x16xf32>
      %55 = vector.shape_cast %54 : vector<1x4x16xf32> to vector<4x16xf32>
      %56 = arith.truncf %55 : vector<4x16xf32> to vector<4x16xbf16>
      %c0_45 = arith.constant 0 : index
      %c199 = arith.constant 199 : index
      %57 = vector.load %arg6[%c0_45, %c199] : memref<16x512xbf16, #tpu.memory_space<vmem>>, vector<4x16xbf16>
      tpu.vector_store %arg6[%c0_45, %c199], %56 {strides = array<i32>} : memref<16x512xbf16, #tpu.memory_space<vmem>>, vector<4x16xbf16>,
      %c0_46 = arith.constant 0 : index
      %c0_47 = arith.constant 0 : index
      %c176 = arith.constant 176 : index
      %58 = vector.load %arg2[%c0_46, %c0_47, %c176] : memref<1x4x256xf32, #tpu.memory_space<vmem>>, vector<1x4x16xf32>
      %59 = vector.shape_cast %58 : vector<1x4x16xf32> to vector<4x16xf32>
      %60 = arith.truncf %59 : vector<4x16xf32> to vector<4x16xbf16>
      %c0_48 = arith.constant 0 : index
      %c217 = arith.constant 217 : index
      %61 = vector.load %arg6[%c0_48, %c217] : memref<16x512xbf16, #tpu.memory_space<vmem>>, vector<4x16xbf16>
      tpu.vector_store %arg6[%c0_48, %c217], %60 {strides = array<i32>} : memref<16x512xbf16, #tpu.memory_space<vmem>>, vector<4x16xbf16>,
      %c0_49 = arith.constant 0 : index
      %c0_50 = arith.constant 0 : index
      %c192 = arith.constant 192 : index
      %62 = vector.load %arg2[%c0_49, %c0_50, %c192] : memref<1x4x256xf32, #tpu.memory_space<vmem>>, vector<1x4x16xf32>
      %63 = vector.shape_cast %62 : vector<1x4x16xf32> to vector<4x16xf32>
      %64 = arith.truncf %63 : vector<4x16xf32> to vector<4x16xbf16>
      %c0_51 = arith.constant 0 : index
      %c235 = arith.constant 235 : index
      %65 = vector.load %arg6[%c0_51, %c235] : memref<16x512xbf16, #tpu.memory_space<vmem>>, vector<4x16xbf16>
      tpu.vector_store %arg6[%c0_51, %c235], %64 {strides = array<i32>} : memref<16x512xbf16, #tpu.memory_space<vmem>>, vector<4x16xbf16>,
      %c0_52 = arith.constant 0 : index
      %c0_53 = arith.constant 0 : index
      %c208 = arith.constant 208 : index
      %66 = vector.load %arg2[%c0_52, %c0_53, %c208] : memref<1x4x256xf32, #tpu.memory_space<vmem>>, vector<1x4x16xf32>
      %67 = vector.shape_cast %66 : vector<1x4x16xf32> to vector<4x16xf32>
      %68 = arith.truncf %67 : vector<4x16xf32> to vector<4x16xbf16>
      %c0_54 = arith.constant 0 : index
      %c253 = arith.constant 253 : index
      %69 = vector.load %arg6[%c0_54, %c253] : memref<16x512xbf16, #tpu.memory_space<vmem>>, vector<4x16xbf16>
      tpu.vector_store %arg6[%c0_54, %c253], %68 {strides = array<i32>} : memref<16x512xbf16, #tpu.memory_space<vmem>>, vector<4x16xbf16>,
      %c0_55 = arith.constant 0 : index
      %c0_56 = arith.constant 0 : index
      %c224 = arith.constant 224 : index
      %70 = vector.load %arg2[%c0_55, %c0_56, %c224] : memref<1x4x256xf32, #tpu.memory_space<vmem>>, vector<1x4x16xf32>
      %71 = vector.shape_cast %70 : vector<1x4x16xf32> to vector<4x16xf32>
      %72 = arith.truncf %71 : vector<4x16xf32> to vector<4x16xbf16>
      %c0_57 = arith.constant 0 : index
      %c271 = arith.constant 271 : index
      %73 = vector.load %arg6[%c0_57, %c271] : memref<16x512xbf16, #tpu.memory_space<vmem>>, vector<4x16xbf16>
      tpu.vector_store %arg6[%c0_57, %c271], %72 {strides = array<i32>} : memref<16x512xbf16, #tpu.memory_space<vmem>>, vector<4x16xbf16>,
      %c0_58 = arith.constant 0 : index
      %c0_59 = arith.constant 0 : index
      %c240 = arith.constant 240 : index
      %74 = vector.load %arg2[%c0_58, %c0_59, %c240] : memref<1x4x256xf32, #tpu.memory_space<vmem>>, vector<1x4x16xf32>
      %75 = vector.shape_cast %74 : vector<1x4x16xf32> to vector<4x16xf32>
      %76 = arith.truncf %75 : vector<4x16xf32> to vector<4x16xbf16>
      %c0_60 = arith.constant 0 : index
      %c289 = arith.constant 289 : index
      %77 = vector.load %arg6[%c0_60, %c289] : memref<16x512xbf16, #tpu.memory_space<vmem>>, vector<4x16xbf16>
      tpu.vector_store %arg6[%c0_60, %c289], %76 {strides = array<i32>} : memref<16x512xbf16, #tpu.memory_space<vmem>>, vector<4x16xbf16>,
      %c0_61 = arith.constant 0 : index
      %c0_62 = arith.constant 0 : index
      %78 = vector.load %arg6[%c0_61, %c0_62] : memref<16x512xbf16, #tpu.memory_space<vmem>>, vector<16x384xbf16>
      %c0_63 = arith.constant 0 : index
      %c0_64 = arith.constant 0 : index
      %79 = vector.load %arg7[%c0_63, %c0_64] : memref<144x384xbf16, #tpu.memory_space<vmem>>, vector<16x384xbf16>
      tpu.vector_store %arg7[%c0_63, %c0_64], %78 {strides = array<i32>} : memref<144x384xbf16, #tpu.memory_space<vmem>>, vector<16x384xbf16>,
      %c0_65 = arith.constant 0 : index
      %c1 = arith.constant 1 : index
      %80 = vector.load %arg6[%c0_65, %c1] : memref<16x512xbf16, #tpu.memory_space<vmem>>, vector<16x384xbf16>
      %c16_66 = arith.constant 16 : index
      %c0_67 = arith.constant 0 : index
      %81 = vector.load %arg7[%c16_66, %c0_67] : memref<144x384xbf16, #tpu.memory_space<vmem>>, vector<16x384xbf16>
      tpu.vector_store %arg7[%c16_66, %c0_67], %80 {strides = array<i32>} : memref<144x384xbf16, #tpu.memory_space<vmem>>, vector<16x384xbf16>,
      %c0_68 = arith.constant 0 : index
      %c2 = arith.constant 2 : index
      %82 = vector.load %arg6[%c0_68, %c2] : memref<16x512xbf16, #tpu.memory_space<vmem>>, vector<16x384xbf16>
      %c32_69 = arith.constant 32 : index
      %c0_70 = arith.constant 0 : index
      %83 = vector.load %arg7[%c32_69, %c0_70] : memref<144x384xbf16, #tpu.memory_space<vmem>>, vector<16x384xbf16>
      tpu.vector_store %arg7[%c32_69, %c0_70], %82 {strides = array<i32>} : memref<144x384xbf16, #tpu.memory_space<vmem>>, vector<16x384xbf16>,
      %c0_71 = arith.constant 0 : index
      %c18 = arith.constant 18 : index
      %84 = vector.load %arg6[%c0_71, %c18] : memref<16x512xbf16, #tpu.memory_space<vmem>>, vector<16x384xbf16>
      %c48_72 = arith.constant 48 : index
      %c0_73 = arith.constant 0 : index
      %85 = vector.load %arg7[%c48_72, %c0_73] : memref<144x384xbf16, #tpu.memory_space<vmem>>, vector<16x384xbf16>
      tpu.vector_store %arg7[%c48_72, %c0_73], %84 {strides = array<i32>} : memref<144x384xbf16, #tpu.memory_space<vmem>>, vector<16x384xbf16>,
      %c0_74 = arith.constant 0 : index
      %c19_75 = arith.constant 19 : index
      %86 = vector.load %arg6[%c0_74, %c19_75] : memref<16x512xbf16, #tpu.memory_space<vmem>>, vector<16x384xbf16>
      %c64_76 = arith.constant 64 : index
      %c0_77 = arith.constant 0 : index
      %87 = vector.load %arg7[%c64_76, %c0_77] : memref<144x384xbf16, #tpu.memory_space<vmem>>, vector<16x384xbf16>
      tpu.vector_store %arg7[%c64_76, %c0_77], %86 {strides = array<i32>} : memref<144x384xbf16, #tpu.memory_space<vmem>>, vector<16x384xbf16>,
      %c0_78 = arith.constant 0 : index
      %c20 = arith.constant 20 : index
      %88 = vector.load %arg6[%c0_78, %c20] : memref<16x512xbf16, #tpu.memory_space<vmem>>, vector<16x384xbf16>
      %c80_79 = arith.constant 80 : index
      %c0_80 = arith.constant 0 : index
      %89 = vector.load %arg7[%c80_79, %c0_80] : memref<144x384xbf16, #tpu.memory_space<vmem>>, vector<16x384xbf16>
      tpu.vector_store %arg7[%c80_79, %c0_80], %88 {strides = array<i32>} : memref<144x384xbf16, #tpu.memory_space<vmem>>, vector<16x384xbf16>,
      %c0_81 = arith.constant 0 : index
      %c36 = arith.constant 36 : index
      %90 = vector.load %arg6[%c0_81, %c36] : memref<16x512xbf16, #tpu.memory_space<vmem>>, vector<16x384xbf16>
      %c96_82 = arith.constant 96 : index
      %c0_83 = arith.constant 0 : index
      %91 = vector.load %arg7[%c96_82, %c0_83] : memref<144x384xbf16, #tpu.memory_space<vmem>>, vector<16x384xbf16>
      tpu.vector_store %arg7[%c96_82, %c0_83], %90 {strides = array<i32>} : memref<144x384xbf16, #tpu.memory_space<vmem>>, vector<16x384xbf16>,
      %c0_84 = arith.constant 0 : index
      %c37_85 = arith.constant 37 : index
      %92 = vector.load %arg6[%c0_84, %c37_85] : memref<16x512xbf16, #tpu.memory_space<vmem>>, vector<16x384xbf16>
      %c112_86 = arith.constant 112 : index
      %c0_87 = arith.constant 0 : index
      %93 = vector.load %arg7[%c112_86, %c0_87] : memref<144x384xbf16, #tpu.memory_space<vmem>>, vector<16x384xbf16>
      tpu.vector_store %arg7[%c112_86, %c0_87], %92 {strides = array<i32>} : memref<144x384xbf16, #tpu.memory_space<vmem>>, vector<16x384xbf16>,
      %c0_88 = arith.constant 0 : index
      %c38 = arith.constant 38 : index
      %94 = vector.load %arg6[%c0_88, %c38] : memref<16x512xbf16, #tpu.memory_space<vmem>>, vector<16x384xbf16>
      %c128_89 = arith.constant 128 : index
      %c0_90 = arith.constant 0 : index
      %95 = vector.load %arg7[%c128_89, %c0_90] : memref<144x384xbf16, #tpu.memory_space<vmem>>, vector<16x384xbf16>
      tpu.vector_store %arg7[%c128_89, %c0_90], %94 {strides = array<i32>} : memref<144x384xbf16, #tpu.memory_space<vmem>>, vector<16x384xbf16>,
    } else {
    }
    %c0 = arith.constant 0 : index
    %c0_1 = arith.constant 0 : index
    %3 = vector.load %arg3[%c0, %c0_1] : memref<8x144xbf16, #tpu.memory_space<vmem>>, vector<8x144xbf16>
    %c0_2 = arith.constant 0 : index
    %c0_3 = arith.constant 0 : index
    %4 = vector.load %arg7[%c0_2, %c0_3] : memref<144x384xbf16, #tpu.memory_space<vmem>>, vector<144x384xbf16>
    %cst = arith.constant dense<0.000000e+00> : vector<8x384xf32>
    %5 = tpu.matmul %3, %4, %cst {dimension_numbers = #tpu.dot_dimension_numbers<[1], [0], [0], [1], [0, 0, 1, 1], [], []>} : vector<8x144xbf16>, vector<144x384xbf16>, vector<8x384xf32> -> vector<8x384xf32>
    %c0_4 = arith.constant 0 : index
    %c0_5 = arith.constant 0 : index
    %6 = vector.load %arg4[%c0_4, %c0_5] : memref<8x1xf32, #tpu.memory_space<vmem>>, vector<8x1xf32>
    %7 = vector.broadcast %6 : vector<8x1xf32> to vector<8x384xf32>
    %8 = arith.addf %5, %7 : vector<8x384xf32>
    %c0_6 = arith.constant 0 : index
    %c0_7 = arith.constant 0 : index
    %c0_8 = arith.constant 0 : index
    %9 = vector.load %arg5[%c0_6, %c0_7, %c0_8] : memref<1x8x384xf32, #tpu.memory_space<vmem>>, vector<1x8x384xf32>
    %10 = vector.shape_cast %9 : vector<1x8x384xf32> to vector<8x384xf32>
    %11 = vector.shape_cast %8 : vector<8x384xf32> to vector<1x8x384xf32>
    tpu.vector_store %arg5[%c0_6, %c0_7, %c0_8], %11 {strides = array<i32>} : memref<1x8x384xf32, #tpu.memory_space<vmem>>, vector<1x8x384xf32>,
    return
  }
  func.func @transform_0(%arg0: i32, %arg1: i32) -> (i32, i32, i32) {
    %c0_i32 = arith.constant 0 : i32
    %c0_i32_0 = arith.constant 0 : i32
    %c0_i32_1 = arith.constant 0 : i32
    return %arg0, %c0_i32, %c0_i32_0 : i32, i32, i32
  }
  func.func @transform_1(%arg0: i32, %arg1: i32) -> (i32, i32) {
    %c0_i32 = arith.constant 0 : i32
    %c0_i32_0 = arith.constant 0 : i32
    return %arg1, %c0_i32 : i32, i32
  }
  func.func @transform_2(%arg0: i32, %arg1: i32) -> (i32, i32) {
    %c0_i32 = arith.constant 0 : i32
    %c0_i32_0 = arith.constant 0 : i32
    return %arg1, %c0_i32 : i32, i32
  }
  func.func @transform_3(%arg0: i32, %arg1: i32) -> (i32, i32, i32) {
    %c0_i32 = arith.constant 0 : i32
    %c0_i32_0 = arith.constant 0 : i32
    return %arg0, %arg1, %c0_i32 : i32, i32, i32
  }
}

</mosaic_0001>

<bundles_post_ra>
// kernel: conv3x3_pallas.1
= control target key start
LH: loop header
LB: loop body
LE: loop exit
PB: predicated region body
PF: predicated region fallthrough
CT: control target
= control target key end

     0   :  { %s966_s12 = smov 0   ;;  %s968_s13 = smov 0   ;;  %s1106_s0 = inlined_call_operand.vmem [shape: f32[2,4,256], index: 0, kind: input, shape index: {}]   ;;  %s1107_s1 = inlined_call_operand.vmem [shape: bf16[8,144], index: 1, kind: input, shape index: {}]   ;;  %s1108_s2 = inlined_call_operand.vmem [shape: f32[8,1], index: 2, kind: input, shape index: {}]   ;;  %s1109_s3 = inlined_call_operand.vmem [shape: f32[2,8,384], index: 3, kind: output, shape index: {}]  }
   0x1   :  { %s970_s14 = smov 0  }
   0x2 LB: > { %s25_s15 = sadd.s32 1, %s915_s13  ;;  %p833_p0 = scmp.ge.s32.totalorder %s919_s14, 1  ;;  %s919_s14 = sphi %s970_s14, %s13_s14   ;;  %s915_s13 = sphi %s968_s13, %s1111_s13   ;;  %s911_s12 = sphi %s966_s12, %s1110_s12  }
   0x3   : > { %p27_p1 = scmp.ge.s32.totalorder %s25_s15, 2  ;;  %p170_p2 = scmp.lt.s32.totalorder %s919_s14, 3 }
   0x5   : > { %s1113_s15 = smov (%p27_p1, %s25_s15), 0  ;;  %p171_p3 = pnand %p833_p0, %p170_p2 }
   0x6   : > { %p207_p4 = scmp.lt.s32.totalorder (!%p171_p3), %s911_s12, 1  ;;  %v921_v0 = vmov (!%p171_p3), 0   ;;  %s922_s20 = smov (!%p171_p3), 31   ;;  %vm295_vm0 = vcmask (!%p171_p3), 115712   ;;  %vm245_vm1 = vcmask (!%p171_p3), 279704   ;;  %vm303_vm2 = vcmask (!%p171_p3), 263304  }
   0x7   : > { %174 = sbr.rel (%p171_p3) target bundleno = 568 (0x238), region = 32  ;;  %236 = vst [vmem:[#allocation2 + $0x8] sm:$0xff] (!%p171_p3), %v921_v0  ;;  %235 = vst [vmem:[#allocation2] sm:$0xff] (!%p171_p3), %v921_v0  ;;  %670 = vmatprep.subr.bf16.mxu1 (!%p171_p3), %v921_v0  ;;  %894 = vset.pattern.permute.xlu0 (!%p171_p3), %v921_v0  ;;  %s923_s21 = smov (!%p171_p3), 19   ;;  %vm311_vm3 = vcmask (!%p171_p3), 410904   ;;  %vm253_vm4 = vcmask (!%p171_p3), 427304  }
   0x8   : > { %237 = vst [vmem:[#allocation2 + $0x10] sm:$0xff] (!%p171_p3), %v921_v0  ;;  %s924_s22 = smov (!%p171_p3), 33   ;;  %s925_s23 = smov (!%p171_p3), 35   ;;  %vm319_vm5 = vcmask (!%p171_p3), 558504   ;;  %vm261_vm6 = vcmask (!%p171_p3), 574904   ;;  %vm327_vm7 = vcmask (!%p171_p3), 706104  }
   0x9   : > { %s926_s24 = smov (!%p171_p3), 21   ;;  %s927_s25 = smov (!%p171_p3), 37   ;;  %vm269_vm8 = vcmask (!%p171_p3), 722504   ;;  %vm335_vm9 = vcmask (!%p171_p3), 853704   ;;  %vm353_vm10 = vcmask (!%p171_p3), 99328   ;;  %vm277_vm11 = vcmask (!%p171_p3), 870104  }
   0xa   : > { %s928_s26 = smov (!%p171_p3), 23   ;;  %s929_s27 = smov (!%p171_p3), 39   ;;  %vm343_vm12 = vcmask (!%p171_p3), 1001304   ;;  %vm361_vm13 = vcmask (!%p171_p3), 246904   ;;  %vm351_vm14 = vcmask (!%p171_p3), 1042408   ;;  %vm285_vm15 = vcmask (!%p171_p3), 1017704  }
   0xb   : > { %s930_s28 = smov (!%p171_p3), 25   ;;  %s931_s29 = smov (!%p171_p3), 41   ;;  %v1051_v52 = vld [vmem:[%s1107_s1] sm:$0xff] (!%p171_p3) }
   0xc   : > { %s932_s30 = smov (!%p171_p3), 45   ;;  %s933_s4 = smov (!%p171_p3), 27   ;;  %v838_v53 = vcombine.high (!%p171_p3), %v1051_v52, %v1051_v52  ;;  %v613_v54 = vld [vmem:[%s1108_s2] sm:$0xff] (!%p171_p3) }
   0xd   : > { %s934_s5 = smov (!%p171_p3), 43   ;;  %s935_s6 = smov (!%p171_p3), 47  }
   0xe   : > { %s1115_s12 = smov (!%p207_p4, %s911_s12), 1  ;;  %s936_s7 = smov 29  }
   0xf   : > { %s843_s16 = sshll.u32 %s1115_s12, 3  ;;  %s937_s8 = smov 49  }
  0x10   : > { %s995_s19 = scalar_lea.vmem %s1106_s0, %s843_s16  ;;  %s938_s9 = smov 127  }
  0x11   : > { %v287_v1 = vld [vmem:[%s995_s19] sm:$0xf]  ;;  %v305_v6 = vld [vmem:[%s995_s19 + $0x4] sm:$0xf]  ;;  %s939_s10 = smov 126   ;;  %s940_s11 = smov 110  }
  0x12   : > { %v239_v2 = vld [vmem:[%s995_s19] sm:$0xf]  ;;  %v288_v4 = vpack.c.bf16 %v287_v1, %v287_v1  ;;  %v306_v8 = vpack.c.bf16 %v305_v6, %v305_v6  ;;  %v313_v10 = vld [vmem:[%s995_s19 + $0x4] sm:$0xf]  ;;  %s941_s16 = smov 109   ;;  %s942_s17 = smov 108  }
  0x13   : > { %v297_v3 = vld [vmem:[%s995_s19] sm:$0xf]  ;;  %v240_v5 = vpack.c.bf16 %v239_v2, %v239_v2  ;;  %v314_v12 = vpack.c.bf16 %v313_v10, %v313_v10  ;;  %v321_v14 = vld [vmem:[%s995_s19 + $0x4] sm:$0xf]  ;;  %s943_s18 = smov 92  }
  0x14   : > { %290 = vrot.lane.b32.xlu0 %v288_v4, %s922_s20  ;;  %v298_v7 = vpack.c.bf16 %v297_v3, %v297_v3  ;;  %v247_v9 = vld [vmem:[%s995_s19] sm:$0xf]  ;;  %v322_v16 = vpack.c.bf16 %v321_v14, %v321_v14  ;;  %v329_v18 = vld [vmem:[%s995_s19 + $0x4] sm:$0xf]  ;;  %s945_s20 = smov 90  }
  0x15   : > { %242 = vrot.lane.b32.xlu1 %v240_v5, %s923_s21  ;;  %v248_v11 = vpack.c.bf16 %v247_v9, %v247_v9  ;;  %v255_v13 = vld [vmem:[%s995_s19] sm:$0xf]  ;;  %v330_v20 = vpack.c.bf16 %v329_v18, %v329_v18  ;;  %v345_v21 = vld [vmem:[%s995_s19 + $0x4] sm:$0xf] }
  0x16   : > { %v256_v15 = vpack.c.bf16 %v255_v13, %v255_v13  ;;  %v263_v17 = vld [vmem:[%s995_s19] sm:$0xf]  ;;  %v346_v23 = vpack.c.bf16 %v345_v21, %v345_v21  ;;  %v337_v25 = vld [vmem:[%s995_s19 + $0x4] sm:$0xf] }
  0x17   : > { %v264_v19 = vpack.c.bf16 %v263_v17, %v263_v17  ;;  %v271_v22 = vld [vmem:[%s995_s19] sm:$0xf]  ;;  %v355_v26 = vld [vmem:[%s995_s19 + $0x4] sm:$0xf]  ;;  %v338_v27 = vpack.c.bf16 %v337_v25, %v337_v25 }
  0x18   : > { %300 = vrot.lane.b32.xlu0 %v298_v7, %s924_s22  ;;  %v272_v24 = vpack.c.bf16 %v271_v22, %v271_v22  ;;  %v356_v28 = vpack.c.bf16 %v355_v26, %v355_v26  ;;  %v279_v29 = vld [vmem:[%s995_s19] sm:$0xf]  ;;  %v363_v30 = vld [vmem:[%s995_s19 + $0x4] sm:$0xf]  ;;  %s944_s19 = smov 91  }
  0x19   : > { %308 = vrot.lane.b32.xlu1 %v306_v8, %s925_s23  ;;  %v280_v31 = vpack.c.bf16 %v279_v29, %v279_v29  ;;  %v364_v32 = vpack.c.bf16 %v363_v30, %v363_v30 }
  0x1c   : > { %250 = vrot.lane.b32.xlu0 %v248_v11, %s926_s24 }
  0x1d   : > { %316 = vrot.lane.b32.xlu1 %v314_v12, %s927_s25  ;;  %s844_s25 = smul.u32 24, %s1115_s12 }
  0x20   : > { %258 = vrot.lane.b32.xlu0 %v256_v15, %s928_s26 }
  0x21   : > { %324 = vrot.lane.b32.xlu1 %v322_v16, %s929_s27 }
  0x24   : > { %266 = vrot.lane.b32.xlu0 %v264_v19, %s930_s28  ;;  %s229_s28 = scalar_lea.vmem %s1109_s3, %s844_s25 }
  0x25   : > { %332 = vrot.lane.b32.xlu1 %v330_v20, %s931_s29 }
  0x28   : > { %348 = vrot.lane.b32.xlu0 %v346_v23, %s932_s30 }
  0x29   : > { %274 = vrot.lane.b32.xlu1 %v272_v24, %s933_s4 }
  0x2c   : > { %340 = vrot.lane.b32.xlu0 %v338_v27, %s934_s5  ;;  %v837_v27 = vcombine.low %v1051_v52, %v1051_v52 }
  0x2d   : > { %358 = vrot.lane.b32.xlu1 %v356_v28, %s935_s6 }
  0x30   : > { %282 = vrot.lane.b32.xlu0 %v280_v31, %s936_s7 }
  0x31   : > { %366 = vrot.lane.b32.xlu1 %v364_v32, %s937_s8 }
  0x35   : > { %391 = vrot.lane.b32.xlu1 %v921_v0, %s938_s9 }
  0x39   : > { %417 = vrot.lane.b32.xlu1 %v921_v0, %s939_s10 }
  0x3d   : > { %443 = vrot.lane.b32.xlu1 %v921_v0, %s940_s11 }
  0x41   : > { %469 = vrot.lane.b32.xlu1 %v921_v0, %s941_s16 }
  0x45   : > { %495 = vrot.lane.b32.xlu1 %v921_v0, %s942_s17 }
  0x49   : > { %521 = vrot.lane.b32.xlu1 %v921_v0, %s943_s18 }
  0x4d   : > { %547 = vrot.lane.b32.xlu1 %v921_v0, %s944_s19 }
  0x86   : > { %v291_v33 = vpop.permute.xlu0 %290 }
  0x87   : > { %v243_v34 = vpop.permute.xlu1 %242  ;;  %296 = vst.msk [vmem:[#allocation2 + $0x8] sm:$0x3] %vm295_vm0, %v291_v33  ;;  %vm369_vm0 = vcmask 394504  }
  0x88   : > { %246 = vst.msk [vmem:[#allocation2] sm:$0x3] %vm245_vm1, %v243_v34  ;;  %vm293_vm1 = vcmask 1042424  }
  0x8a   : > { %v301_v35 = vpop.permute.xlu0 %300 }
  0x8b   : > { %v309_v36 = vpop.permute.xlu1 %308  ;;  %304 = vst.msk [vmem:[#allocation2 + $0x8] sm:$0x3] %vm303_vm2, %v301_v35  ;;  %vm625_vm2 = vcmask 130048  }
  0x8c   : > { %312 = vst.msk [vmem:[#allocation2 + $0x8] sm:$0x3] %vm311_vm3, %v309_v36  ;;  %840 = vmatprep.mubr.msk.bf16.mxu1 %vm625_vm2, %v838_v53  ;;  %839 = vmatprep.mubr.msk.bf16.mxu0 %vm625_vm2, %v838_v53  ;;  %vm393_vm3 = vcmask 1039360  }
  0x8e   : > { %v251_v37 = vpop.permute.xlu0 %250 }
  0x8f   : > { %v317_v38 = vpop.permute.xlu1 %316  ;;  %254 = vst.msk [vmem:[#allocation2] sm:$0x3] %vm253_vm4, %v251_v37  ;;  %vm419_vm4 = vcmask 1031168  }
  0x90   : > { %320 = vst.msk [vmem:[#allocation2 + $0x8] sm:$0x3] %vm319_vm5, %v317_v38  ;;  %vm445_vm5 = vcmask 900096  }
  0x92   : > { %v259_v39 = vpop.permute.xlu0 %258 }
  0x93   : > { %v325_v40 = vpop.permute.xlu1 %324  ;;  %262 = vst.msk [vmem:[#allocation2] sm:$0x3] %vm261_vm6, %v259_v39  ;;  %vm471_vm6 = vcmask 891904  }
  0x94   : > { %328 = vst.msk [vmem:[#allocation2 + $0x8] sm:$0x3] %vm327_vm7, %v325_v40  ;;  %vm497_vm7 = vcmask 883712  }
  0x96   : > { %v267_v41 = vpop.permute.xlu0 %266 }
  0x97   : > { %v333_v42 = vpop.permute.xlu1 %332  ;;  %270 = vst.msk [vmem:[#allocation2] sm:$0x3] %vm269_vm8, %v267_v41  ;;  %vm523_vm8 = vcmask 752640  }
  0x98   : > { %336 = vst.msk [vmem:[#allocation2 + $0x8] sm:$0x3] %vm335_vm9, %v333_v42  ;;  %vm549_vm9 = vcmask 744448  }
  0x9a   : > { %v349_v43 = vpop.permute.xlu0 %348 }
  0x9b   : > { %v275_v44 = vpop.permute.xlu1 %274  ;;  %354 = vst.msk [vmem:[#allocation2 + $0x10] sm:$0x3] %vm353_vm10, %v349_v43  ;;  %vm575_vm10 = vcmask 736256  }
  0x9c   : > { %278 = vst.msk [vmem:[#allocation2] sm:$0x3] %vm277_vm11, %v275_v44 }
  0x9e   : > { %v341_v45 = vpop.permute.xlu0 %340 }
  0x9f   : > { %v359_v46 = vpop.permute.xlu1 %358  ;;  %344 = vst.msk [vmem:[#allocation2 + $0x8] sm:$0x3] %vm343_vm12, %v341_v45 }
  0xa0   : > { %362 = vst.msk [vmem:[#allocation2 + $0x10] sm:$0x3] %vm361_vm13, %v359_v46 }
  0xa1   : > { %352 = vst.msk [vmem:[#allocation2 + $0x8] sm:$0x3] %vm351_vm14, %v349_v43 }
  0xa2   : > { %v283_v47 = vpop.permute.xlu0 %282 }
  0xa3   : > { %v367_v48 = vpop.permute.xlu1 %366  ;;  %286 = vst.msk [vmem:[#allocation2] sm:$0x3] %vm285_vm15, %v283_v47 }
  0xa4   : > { %370 = vst.msk [vmem:[#allocation2 + $0x10] sm:$0x3] %vm369_vm0, %v367_v48 }
  0xa5   : > { %294 = vst.msk [vmem:[#allocation2] sm:$0x3] %vm293_vm1, %v291_v33 }
  0xa7   : > { %v392_v55 = vpop.permute.xlu1 %391 }
  0xa8   : > { %v372_v49 = vld [vmem:[#allocation2 + $0x8] sm:$0xff] }
  0xa9   : > { %629 = vmatprep.subr.bf16.mxu0 %v372_v49 }
  0xab   : > { %v379_v50 = vld [vmem:[#allocation2 + $0x10] sm:$0xff]  ;;  %v418_v56 = vpop.permute.xlu1 %417 }
  0xac   : > { %389 = vrot.lane.b32.xlu1 %v379_v50, %s938_s9  ;;  %v377_v51 = vld [vmem:[#allocation2] sm:$0xff]  ;;  %671 = vmatpush1.bf16.msra.mxu1 %v379_v50 }
  0xad   : > { %385 = vrot.lane.b32.xlu0 %v377_v51, %s938_s9  ;;  %630 = vmatpush1.bf16.msra.mxu0 %v377_v51 }
  0xae   : > { %672 = vmatprep.subr.bf16.mxu1 %v921_v0 }
  0xaf   : > { %v444_v57 = vpop.permute.xlu1 %443 }
  0xb0   : > { %415 = vrot.lane.b32.xlu1 %v379_v50, %s939_s10 }
  0xb1   : > { %411 = vrot.lane.b32.xlu0 %v377_v51, %s939_s10 }
  0xb3   : > { %v470_v58 = vpop.permute.xlu1 %469 }
  0xb4   : > { %441 = vrot.lane.b32.xlu1 %v379_v50, %s940_s11 }
  0xb5   : > { %437 = vrot.lane.b32.xlu0 %v377_v51, %s940_s11 }
  0xb7   : > { %v496_v59 = vpop.permute.xlu1 %495 }
  0xb8   : > { %467 = vrot.lane.b32.xlu1 %v379_v50, %s941_s16 }
  0xb9   : > { %463 = vrot.lane.b32.xlu0 %v377_v51, %s941_s16 }
  0xbb   : > { %v522_v60 = vpop.permute.xlu1 %521 }
  0xbc   : > { %493 = vrot.lane.b32.xlu1 %v379_v50, %s942_s17 }
  0xbd   : > { %489 = vrot.lane.b32.xlu0 %v377_v51, %s942_s17 }
  0xbf   : > { %v548_v61 = vpop.permute.xlu1 %547 }
  0xc0   : > { %519 = vrot.lane.b32.xlu1 %v379_v50, %s943_s18 }
  0xc1   : > { %515 = vrot.lane.b32.xlu0 %v377_v51, %s943_s18 }
  0xc4   : > { %545 = vrot.lane.b32.xlu1 %v379_v50, %s944_s19 }
  0xc5   : > { %541 = vrot.lane.b32.xlu0 %v377_v51, %s944_s19 }
  0xc8   : > { %571 = vrot.lane.b32.xlu1 %v379_v50, %s945_s20 }
  0xc9   : > { %387 = vrot.lane.b32.xlu0 %v372_v49, %s938_s9 }
  0xcc   : > { %573 = vrot.lane.b32.xlu1 %v921_v0, %s945_s20 }
  0xcd   : > { %413 = vrot.lane.b32.xlu0 %v372_v49, %s939_s10 }
  0xd1   : > { %439 = vrot.lane.b32.xlu0 %v372_v49, %s940_s11 }
  0xd5   : > { %465 = vrot.lane.b32.xlu0 %v372_v49, %s941_s16 }
  0xd9   : > { %491 = vrot.lane.b32.xlu0 %v372_v49, %s942_s17 }
  0xdd   : > { %517 = vrot.lane.b32.xlu0 %v372_v49, %s943_s18 }
  0xe1   : > { %543 = vrot.lane.b32.xlu0 %v372_v49, %s944_s19 }
  0xe5   : > { %569 = vrot.lane.b32.xlu0 %v372_v49, %s945_s20 }
  0xe9   : > { %567 = vrot.lane.b32.xlu0 %v377_v51, %s945_s20 }
  0xed   : > { %616 = vperm.xlu0 %894, %v613_v54  }
 0x11e   : > { %v390_v62 = vpop.permute.xlu1 %389 }
 0x11f   : > { %v386_v63 = vpop.permute.xlu0 %385  ;;  %v396_v1 = vsel %vm393_vm3, %v390_v62, %v392_v55 }
 0x120   : > { %673 = vmatpush1.bf16.msra.mxu1 %v396_v1 }
 0x121   : > { %674 = vmatprep.subr.bf16.mxu1 %v921_v0 }
 0x122   : > { %v416_v2 = vpop.permute.xlu1 %415 }
 0x123   : > { %v412_v3 = vpop.permute.xlu0 %411  ;;  %v422_v4 = vsel %vm419_vm4, %v416_v2, %v418_v56 }
 0x124   : > { %675 = vmatpush1.bf16.msra.mxu1 %v422_v4 }
 0x125   : > { %676 = vmatprep.subr.bf16.mxu1 %v921_v0 }
 0x126   : > { %v442_v5 = vpop.permute.xlu1 %441 }
 0x127   : > { %v438_v6 = vpop.permute.xlu0 %437  ;;  %v448_v7 = vsel %vm445_vm5, %v442_v5, %v444_v57 }
 0x128   : > { %677 = vmatpush1.bf16.msra.mxu1 %v448_v7 }
 0x129   : > { %678 = vmatprep.subr.bf16.mxu1 %v921_v0 }
 0x12a   : > { %v468_v8 = vpop.permute.xlu1 %467 }
 0x12b   : > { %v464_v9 = vpop.permute.xlu0 %463  ;;  %v474_v10 = vsel %vm471_vm6, %v468_v8, %v470_v58 }
 0x12c   : > { %679 = vmatpush1.bf16.msra.mxu1 %v474_v10 }
 0x12d   : > { %680 = vmatprep.subr.bf16.mxu1 %v921_v0 }
 0x12e   : > { %v494_v11 = vpop.permute.xlu1 %493 }
 0x12f   : > { %v490_v12 = vpop.permute.xlu0 %489  ;;  %v500_v13 = vsel %vm497_vm7, %v494_v11, %v496_v59 }
 0x130   : > { %681 = vmatpush1.bf16.msra.mxu1 %v500_v13 }
 0x131   : > { %682 = vmatprep.subr.bf16.mxu1 %v921_v0 }
 0x132   : > { %v520_v14 = vpop.permute.xlu1 %519 }
 0x133   : > { %v516_v15 = vpop.permute.xlu0 %515  ;;  %v526_v16 = vsel %vm523_vm8, %v520_v14, %v522_v60 }
 0x134   : > { %683 = vmatpush1.bf16.msra.mxu1 %v526_v16 }
 0x135   : > { %684 = vmatprep.subr.bf16.mxu1 %v921_v0 }
 0x136   : > { %v546_v17 = vpop.permute.xlu1 %545 }
 0x137   : > { %v542_v18 = vpop.permute.xlu0 %541  ;;  %v552_v19 = vsel %vm549_vm9, %v546_v17, %v548_v61 }
 0x138   : > { %685 = vmatpush1.bf16.msra.mxu1 %v552_v19 }
 0x139   : > { %686 = vmatprep.subr.bf16.mxu1 %v921_v0 }
 0x13a   : > { %v572_v20 = vpop.permute.xlu1 %571 }
 0x13b   : > { %v388_v21 = vpop.permute.xlu0 %387 }
 0x13c   : > { %v395_v22 = vsel %vm393_vm3, %v388_v21, %v390_v62  ;;  %v394_v23 = vsel %vm393_vm3, %v386_v63, %v388_v21 }
 0x13d   : > { %631 = vmatprep.subr.bf16.mxu0 %v395_v22 }
 0x13e   : > { %632 = vmatpush1.bf16.msra.mxu0 %v394_v23  ;;  %v574_v24 = vpop.permute.xlu1 %573 }
 0x13f   : > { %v414_v25 = vpop.permute.xlu0 %413  ;;  %v578_v26 = vsel %vm575_vm10, %v572_v20, %v574_v24 }
 0x140   : > { %687 = vmatpush1.bf16.msra.mxu1 %v578_v26  ;;  %v421_v28 = vsel %vm419_vm4, %v414_v25, %v416_v2  ;;  %v420_v0 = vsel %vm419_vm4, %v412_v3, %v414_v25 }
 0x141   : > { %633 = vmatprep.subr.bf16.mxu0 %v421_v28 }
 0x142   : > { %634 = vmatpush1.bf16.msra.mxu0 %v420_v0 }
 0x143   : > { %v440_v29 = vpop.permute.xlu0 %439  ;;  %703 = vmatmul.mubr.bf16.vlgmr.msra.gmra.mrb[0].mxu1 %v837_v27 }
 0x144   : > { %v447_v30 = vsel %vm445_vm5, %v440_v29, %v442_v5  ;;  %v446_v31 = vsel %vm445_vm5, %v438_v6, %v440_v29 }
 0x145   : > { %635 = vmatprep.subr.bf16.mxu0 %v447_v30 }
 0x146   : > { %636 = vmatpush1.bf16.msra.mxu0 %v446_v31 }
 0x147   : > { %v466_v32 = vpop.permute.xlu0 %465 }
 0x148   : > { %v473_v33 = vsel %vm471_vm6, %v466_v32, %v468_v8  ;;  %v472_v34 = vsel %vm471_vm6, %v464_v9, %v466_v32 }
 0x149   : > { %637 = vmatprep.subr.bf16.mxu0 %v473_v33 }
 0x14a   : > { %638 = vmatpush1.bf16.msra.mxu0 %v472_v34 }
 0x14b   : > { %v492_v35 = vpop.permute.xlu0 %491 }
 0x14c   : > { %v499_v36 = vsel %vm497_vm7, %v492_v35, %v494_v11  ;;  %v498_v37 = vsel %vm497_vm7, %v490_v12, %v492_v35 }
 0x14d   : > { %639 = vmatprep.subr.bf16.mxu0 %v499_v36 }
 0x14e   : > { %640 = vmatpush1.bf16.msra.mxu0 %v498_v37 }
 0x14f   : > { %v518_v38 = vpop.permute.xlu0 %517 }
 0x150   : > { %v525_v39 = vsel %vm523_vm8, %v518_v38, %v520_v14  ;;  %v524_v40 = vsel %vm523_vm8, %v516_v15, %v518_v38 }
 0x151   : > { %641 = vmatprep.subr.bf16.mxu0 %v525_v39 }
 0x152   : > { %642 = vmatpush1.bf16.msra.mxu0 %v524_v40 }
 0x153   : > { %v544_v41 = vpop.permute.xlu0 %543 }
 0x154   : > { %v551_v42 = vsel %vm549_vm9, %v544_v41, %v546_v17  ;;  %v550_v43 = vsel %vm549_vm9, %v542_v18, %v544_v41 }
 0x155   : > { %643 = vmatprep.subr.bf16.mxu0 %v551_v42 }
 0x156   : > { %644 = vmatpush1.bf16.msra.mxu0 %v550_v43 }
 0x157   : > { %v570_v44 = vpop.permute.xlu0 %569 }
 0x158   : > { %v577_v45 = vsel %vm575_vm10, %v570_v44, %v572_v20 }
 0x159   : > { %645 = vmatprep.subr.bf16.mxu0 %v577_v45 }
 0x15b   : > { %v568_v46 = vpop.permute.xlu0 %567 }
 0x15c   : > { %v576_v47 = vsel %vm575_vm10, %v568_v46, %v570_v44 }
 0x15d   : > { %646 = vmatpush1.bf16.msra.mxu0 %v576_v47 }
 0x160   : > { %662 = vmatmul.mubr.bf16.vlgmr.msra.gmra.mrb[0].mxu0 %v837_v27 }
 0x16c   : > { %v617_v48 = vpop.permute.xlu0 %616 }
 0x216   : > { %v704_v49 = vpop.f32.mrb[0].mxu1 }
 0x217   : > { %v706_v50 = vpop.f32.mrb[1].mxu1  ;;  %v705_v51 = vadd.f32 %v704_v49, %v617_v48 }
 0x218   : > { %v707_v52 = vpop.f32.mrb[2].mxu1 }
 0x219   : > { %712 = vst [vmem:[%s229_s28 + $0x10] sm:$0xff] %v705_v51  ;;  %v708_v53 = vpop.f32.mrb[3].mxu1 }
 0x233   : > { %v663_v54 = vpop.f32.mrb[0].mxu0 }
 0x234   : > { %v664_v55 = vadd.f32 %v663_v54, %v617_v48  ;;  %v665_v56 = vpop.f32.mrb[1].mxu0 }
 0x235   : > { %v666_v57 = vadd.f32 %v665_v56, %v617_v48  ;;  %v667_v58 = vpop.f32.mrb[2].mxu0 }
 0x236   : > { %710 = vst [vmem:[%s229_s28] sm:$0xff] %v664_v55  ;;  %v668_v59 = vpop.f32.mrb[3].mxu0 }
 0x237   : > { %711 = vst [vmem:[%s229_s28 + $0x8] sm:$0xff] %v666_v57 }
 0x238 PF: > { %s13_s14 = sadd.s32 1, %s919_s14   ;;  %s1110_s12 = smov %s915_s13 }
 0x239   : > { %p10_p5 = scmp.ge.s32.totalorder %s13_s14, 4   ;;  %s1111_s13 = smov %s1113_s15 }
 0x23b   :  { %12 = sbr.rel (!%p10_p5) target bundleno = 2 (0x2), region = 72 }

</bundles_post_ra>
